<compile_context>
chip_gen: v7x
topology: tpu7x:2x2x1
jax: 0.10.0
libtpu: 0.0.40
codegen_flags: <defaults>
</compile_context>

<pallas_src>
import jax
import jax.numpy as jnp
from jax import lax
from jax.experimental import pallas as pl
from jax.experimental.pallas import tpu as pltpu

BN_EPS = 1e-5


def _make_block_kernel(B, H, W, C):
    """Whole forward pass fused into a single lane-dense Pallas kernel."""
    BH = B * H
    inv_n = 1.0 / float(B * H * W)

    def kernel(x_ref, mu_ref, md_ref, w1_ref, w2_ref, g_ref,
               gamma_ref, beta_ref, o_ref):
        x0 = x_ref[...].astype(jnp.float32)       # (B*H, W*C), lane-dense
        mask_up = mu_ref[...]                     # (B*H, W*C): 0 where h == 0
        mask_dn = md_ref[...]                     # (B*H, W*C): 0 where h == H-1
        gmat = g_ref[...]                         # (W*C, W*C) channel grouper
        gamma = gamma_ref[...]                    # (1, W*C)
        beta = beta_ref[...]                      # (1, W*C)

        def conv3x3(v, w_ref):
            # +/-1 H-shift with zero image borders: XLU sublane rotate + VPU
            # mask (both off the MXU critical slot).
            v_up = pltpu.roll(v, shift=1, axis=0) * mask_up        # row h-1
            v_dn = pltpu.roll(v, shift=BH - 1, axis=0) * mask_dn   # row h+1
            # Three lane-dense banded matmuls: kw taps + Cin->Cout per call.
            out = jnp.dot(v_up, w_ref[0], preferred_element_type=jnp.float32)
            out = out + jnp.dot(v, w_ref[1], preferred_element_type=jnp.float32)
            out = out + jnp.dot(v_dn, w_ref[2], preferred_element_type=jnp.float32)
            return out                            # (B*H, W*C) f32

        def batch_norm(y):
            # One-pass batch statistics over (B, H, W):
            #   XLU row reduce -> channel-group reduce + re-broadcast via gmat.
            s1 = jnp.dot(jnp.sum(y, axis=0, keepdims=True), gmat,
                         preferred_element_type=jnp.float32)      # (1, W*C)
            s2 = jnp.dot(jnp.sum(y * y, axis=0, keepdims=True), gmat,
                         preferred_element_type=jnp.float32)      # (1, W*C)
            mean = s1 * inv_n
            var = s2 * inv_n - mean * mean        # biased var (training mode)
            scale = lax.rsqrt(var + BN_EPS) * gamma
            shift = beta - mean * scale
            return y * scale + shift              # single mul+add per element

        h = jnp.maximum(batch_norm(conv3x3(x0, w1_ref)), 0.0)   # conv1,BN2,relu
        h = batch_norm(conv3x3(h, w2_ref))                      # conv2,BN2
        # residual add + relu (module's print() calls are debug-only; omitted)
        o_ref[...] = jnp.maximum(h + x0, 0.0).astype(o_ref.dtype)

    return kernel


def _band_weights(w_oihw, W, C):
    """(Cout,Cin,3,3) OIHW weight -> (3, W*C, W*C) block-banded matrices.

    band[kh][w_src*C + ci, w_dst*C + co] = w_hwio[kh, kw=w_src-w_dst+1, ci, co]
    for kw in {0,1,2}, else 0 — so `x_shifted_by_kh @ band[kh]` performs the
    three kw taps and the Cin->Cout contraction for every output column at
    once (W-border zero padding falls out of the band structure).
    """
    w_hwio = jnp.transpose(w_oihw, (2, 3, 1, 0)).astype(jnp.float32)  # (3,3,Ci,Co)
    w_src = jnp.arange(W)[:, None]
    w_dst = jnp.arange(W)[None, :]
    kw = w_src - w_dst + 1                                            # (W, W)
    valid = (kw >= 0) & (kw <= 2)
    blocks = w_hwio[:, jnp.clip(kw, 0, 2)]                            # (3,W,W,Ci,Co)
    blocks = jnp.where(valid[None, :, :, None, None], blocks, 0.0)
    # rows = w_src*C + ci, cols = w_dst*C + co
    return blocks.transpose(0, 1, 3, 2, 4).reshape(3, W * C, W * C)


@jax.jit
def block_forward(x_nchw, w1_oihw, w2_oihw, gamma, beta):
    """Wrapper: NCHW/OIHW (PyTorch) -> lane-dense (B*H, W*C) -> kernel -> NCHW."""
    B, C, H, W = x_nchw.shape
    BH, WC = B * H, W * C

    # Lane-dense slab: pure reshape of the row-major NHWC buffer.
    x2d = jnp.transpose(x_nchw, (0, 2, 3, 1)).reshape(BH, WC)

    wband1 = _band_weights(w1_oihw, W, C)
    wband2 = _band_weights(w2_oihw, W, C)

    # Border masks for the +/-1 H-shift (zero at image h-borders and across
    # batch boundaries).  Full (BH, WC) slabs so the kernel does a plain
    # elementwise multiply with no in-kernel broadcast.
    h_idx = jnp.arange(BH) % H
    mask_up = jnp.broadcast_to(
        (h_idx != 0).astype(jnp.float32)[:, None], (BH, WC))
    mask_dn = jnp.broadcast_to(
        (h_idx != H - 1).astype(jnp.float32)[:, None], (BH, WC))

    # Channel-group reduce/broadcast matrix for BN statistics.
    lane = jnp.arange(WC)
    gmat = (lane[:, None] % C == lane[None, :] % C).astype(jnp.float32)

    gamma_wc = jnp.tile(gamma.astype(jnp.float32), W).reshape(1, WC)
    beta_wc = jnp.tile(beta.astype(jnp.float32), W).reshape(1, WC)

    vmem = pl.BlockSpec(memory_space=pltpu.MemorySpace.VMEM)
    out2d = pl.pallas_call(
        _make_block_kernel(B, H, W, C),
        out_shape=jax.ShapeDtypeStruct((BH, WC), x_nchw.dtype),
        in_specs=[vmem] * 8,
        out_specs=vmem,
    )(x2d, mask_up, mask_dn, wband1, wband2, gmat, gamma_wc, beta_wc)

    return jnp.transpose(out2d.reshape(B, H, W, C), (0, 3, 1, 2))   # NCHW


# ------------------------- pure-JAX reference (NCHW) -------------------------
def _ref_forward(x, w1, w2, gamma, beta):
    def conv(v, w):
        return lax.conv_general_dilated(
            v, w, window_strides=(1, 1), padding=((1, 1), (1, 1)),
            dimension_numbers=("NCHW", "OIHW", "NCHW"))

    def bn(v):
        mean = jnp.mean(v, axis=(0, 2, 3), keepdims=True)
        var = jnp.mean((v - mean) ** 2, axis=(0, 2, 3), keepdims=True)
        g = gamma.reshape(1, -1, 1, 1)
        b = beta.reshape(1, -1, 1, 1)
        return (v - mean) * lax.rsqrt(var + BN_EPS) * g + b

    identity = x
    h = jax.nn.relu(bn(conv(x, w1)))
    h = bn(conv(h, w2))
    return jax.nn.relu(h + identity)


if __name__ == "__main__":
    # small shapes consistent with the module: in_channels == out_channels.
    # C=8, W=16 makes the kernel's lane dim W*C = 128 (fully lane-dense).
    B, C, H, W = 2, 8, 16, 16

    key = jax.random.PRNGKey(0)
    kx, k1, k2, kg, kb = jax.random.split(key, 5)
    x = jax.random.normal(kx, (B, C, H, W), jnp.float32)
    # deterministic synthetic params (PyTorch would use kaiming-uniform / 1 / 0)
    w1 = jax.random.normal(k1, (C, C, 3, 3), jnp.float32) * 0.1   # OIHW
    w2 = jax.random.normal(k2, (C, C, 3, 3), jnp.float32) * 0.1   # OIHW
    gamma = 1.0 + 0.1 * jax.random.normal(kg, (C,), jnp.float32)  # BN2 weight
    beta = 0.1 * jax.random.normal(kb, (C,), jnp.float32)         # BN2 bias

    out = block_forward(x, w1, w2, gamma, beta)
    out = jax.block_until_ready(out)

    ref = _ref_forward(x, w1, w2, gamma, beta)
    assert out.shape == (B, C, H, W)
    assert jnp.allclose(out, ref, atol=1e-4, rtol=1e-4), "mismatch vs reference"
    print("KERNEL_OK")
</pallas_src>

<mosaic_0001>
module attributes {stable_mosaic.version = 11 : i64} {
  func.func @kernel(%arg0: memref<32x128xf32, #tpu.memory_space<vmem>>, %arg1: memref<32x128xf32, #tpu.memory_space<vmem>>, %arg2: memref<32x128xf32, #tpu.memory_space<vmem>>, %arg3: memref<3x128x128xf32, #tpu.memory_space<vmem>>, %arg4: memref<3x128x128xf32, #tpu.memory_space<vmem>>, %arg5: memref<128x128xf32, #tpu.memory_space<vmem>>, %arg6: memref<1x128xf32, #tpu.memory_space<vmem>>, %arg7: memref<1x128xf32, #tpu.memory_space<vmem>>, %arg8: memref<32x128xf32, #tpu.memory_space<vmem>>) attributes {dimension_semantics = [], scalar_prefetch = 0 : i64, scratch_operands = 0 : i64, tpu.core_type = #tpu.core_type<tc>} {
    %c0 = arith.constant 0 : index
    %c0_0 = arith.constant 0 : index
    %0 = vector.load %arg0[%c0, %c0_0] : memref<32x128xf32, #tpu.memory_space<vmem>>, vector<32x128xf32>
    %c0_1 = arith.constant 0 : index
    %c0_2 = arith.constant 0 : index
    %1 = vector.load %arg1[%c0_1, %c0_2] : memref<32x128xf32, #tpu.memory_space<vmem>>, vector<32x128xf32>
    %c0_3 = arith.constant 0 : index
    %c0_4 = arith.constant 0 : index
    %2 = vector.load %arg2[%c0_3, %c0_4] : memref<32x128xf32, #tpu.memory_space<vmem>>, vector<32x128xf32>
    %c0_5 = arith.constant 0 : index
    %c0_6 = arith.constant 0 : index
    %3 = vector.load %arg5[%c0_5, %c0_6] : memref<128x128xf32, #tpu.memory_space<vmem>>, vector<128x128xf32>
    %c0_7 = arith.constant 0 : index
    %c0_8 = arith.constant 0 : index
    %4 = vector.load %arg6[%c0_7, %c0_8] : memref<1x128xf32, #tpu.memory_space<vmem>>, vector<1x128xf32>
    %c0_9 = arith.constant 0 : index
    %c0_10 = arith.constant 0 : index
    %5 = vector.load %arg7[%c0_9, %c0_10] : memref<1x128xf32, #tpu.memory_space<vmem>>, vector<1x128xf32>
    %c1_i32 = arith.constant 1 : i32
    %6 = tpu.dynamic_rotate %0 by %c1_i32 dim 0 : vector<32x128xf32>, i32 -> vector<32x128xf32>
    %7 = arith.mulf %6, %1 : vector<32x128xf32>
    %c31_i32 = arith.constant 31 : i32
    %8 = tpu.dynamic_rotate %0 by %c31_i32 dim 0 : vector<32x128xf32>, i32 -> vector<32x128xf32>
    %9 = arith.mulf %8, %2 : vector<32x128xf32>
    %c0_11 = arith.constant 0 : index
    %c0_12 = arith.constant 0 : index
    %c0_13 = arith.constant 0 : index
    %10 = vector.load %arg3[%c0_11, %c0_12, %c0_13] : memref<3x128x128xf32, #tpu.memory_space<vmem>>, vector<1x128x128xf32>
    %11 = vector.shape_cast %10 : vector<1x128x128xf32> to vector<128x128xf32>
    %cst = arith.constant dense<0.000000e+00> : vector<32x128xf32>
    %12 = tpu.matmul %7, %11, %cst {dimension_numbers = #tpu.dot_dimension_numbers<[1], [0], [0], [1], [0, 0, 1, 1], [], []>} : vector<32x128xf32>, vector<128x128xf32>, vector<32x128xf32> -> vector<32x128xf32>
    %c1 = arith.constant 1 : index
    %c0_14 = arith.constant 0 : index
    %c0_15 = arith.constant 0 : index
    %13 = vector.load %arg3[%c1, %c0_14, %c0_15] : memref<3x128x128xf32, #tpu.memory_space<vmem>>, vector<1x128x128xf32>
    %14 = vector.shape_cast %13 : vector<1x128x128xf32> to vector<128x128xf32>
    %cst_16 = arith.constant dense<0.000000e+00> : vector<32x128xf32>
    %15 = tpu.matmul %0, %14, %cst_16 {dimension_numbers = #tpu.dot_dimension_numbers<[1], [0], [0], [1], [0, 0, 1, 1], [], []>} : vector<32x128xf32>, vector<128x128xf32>, vector<32x128xf32> -> vector<32x128xf32>
    %16 = arith.addf %12, %15 : vector<32x128xf32>
    %c2 = arith.constant 2 : index
    %c0_17 = arith.constant 0 : index
    %c0_18 = arith.constant 0 : index
    %17 = vector.load %arg3[%c2, %c0_17, %c0_18] : memref<3x128x128xf32, #tpu.memory_space<vmem>>, vector<1x128x128xf32>
    %18 = vector.shape_cast %17 : vector<1x128x128xf32> to vector<128x128xf32>
    %cst_19 = arith.constant dense<0.000000e+00> : vector<32x128xf32>
    %19 = tpu.matmul %9, %18, %cst_19 {dimension_numbers = #tpu.dot_dimension_numbers<[1], [0], [0], [1], [0, 0, 1, 1], [], []>} : vector<32x128xf32>, vector<128x128xf32>, vector<32x128xf32> -> vector<32x128xf32>
    %20 = arith.addf %16, %19 : vector<32x128xf32>
    %cst_20 = arith.constant dense<0.000000e+00> : vector<128xf32>
    %21 = vector.multi_reduction <add>, %20, %cst_20 [0] : vector<32x128xf32> to vector<128xf32>
    %22 = vector.shape_cast %21 : vector<128xf32> to vector<1x128xf32>
    %cst_21 = arith.constant dense<0.000000e+00> : vector<1x128xf32>
    %23 = tpu.matmul %22, %3, %cst_21 {dimension_numbers = #tpu.dot_dimension_numbers<[1], [0], [0], [1], [0, 0, 1, 1], [], []>} : vector<1x128xf32>, vector<128x128xf32>, vector<1x128xf32> -> vector<1x128xf32>
    %24 = arith.mulf %20, %20 : vector<32x128xf32>
    %cst_22 = arith.constant dense<0.000000e+00> : vector<128xf32>
    %25 = vector.multi_reduction <add>, %24, %cst_22 [0] : vector<32x128xf32> to vector<128xf32>
    %26 = vector.shape_cast %25 : vector<128xf32> to vector<1x128xf32>
    %cst_23 = arith.constant dense<0.000000e+00> : vector<1x128xf32>
    %27 = tpu.matmul %26, %3, %cst_23 {dimension_numbers = #tpu.dot_dimension_numbers<[1], [0], [0], [1], [0, 0, 1, 1], [], []>} : vector<1x128xf32>, vector<128x128xf32>, vector<1x128xf32> -> vector<1x128xf32>
    %cst_24 = arith.constant 0.001953125 : f32
    %28 = vector.broadcast %cst_24 : f32 to vector<1x128xf32>
    %29 = arith.mulf %23, %28 : vector<1x128xf32>
    %cst_25 = arith.constant 0.001953125 : f32
    %30 = vector.broadcast %cst_25 : f32 to vector<1x128xf32>
    %31 = arith.mulf %27, %30 : vector<1x128xf32>
    %32 = arith.mulf %29, %29 : vector<1x128xf32>
    %33 = arith.subf %31, %32 : vector<1x128xf32>
    %cst_26 = arith.constant 9.99999974E-6 : f32
    %34 = vector.broadcast %cst_26 : f32 to vector<1x128xf32>
    %35 = arith.addf %33, %34 : vector<1x128xf32>
    %36 = math.rsqrt %35 : vector<1x128xf32>
    %37 = arith.mulf %36, %4 : vector<1x128xf32>
    %38 = arith.mulf %29, %37 : vector<1x128xf32>
    %39 = arith.subf %5, %38 : vector<1x128xf32>
    %40 = vector.broadcast %37 : vector<1x128xf32> to vector<32x128xf32>
    %41 = arith.mulf %20, %40 : vector<32x128xf32>
    %42 = vector.broadcast %39 : vector<1x128xf32> to vector<32x128xf32>
    %43 = arith.addf %41, %42 : vector<32x128xf32>
    %cst_27 = arith.constant 0.000000e+00 : f32
    %44 = vector.broadcast %cst_27 : f32 to vector<32x128xf32>
    %45 = arith.maximumf %43, %44 : vector<32x128xf32>
    %c1_i32_28 = arith.constant 1 : i32
    %46 = tpu.dynamic_rotate %45 by %c1_i32_28 dim 0 : vector<32x128xf32>, i32 -> vector<32x128xf32>
    %47 = arith.mulf %46, %1 : vector<32x128xf32>
    %c31_i32_29 = arith.constant 31 : i32
    %48 = tpu.dynamic_rotate %45 by %c31_i32_29 dim 0 : vector<32x128xf32>, i32 -> vector<32x128xf32>
    %49 = arith.mulf %48, %2 : vector<32x128xf32>
    %c0_30 = arith.constant 0 : index
    %c0_31 = arith.constant 0 : index
    %c0_32 = arith.constant 0 : index
    %50 = vector.load %arg4[%c0_30, %c0_31, %c0_32] : memref<3x128x128xf32, #tpu.memory_space<vmem>>, vector<1x128x128xf32>
    %51 = vector.shape_cast %50 : vector<1x128x128xf32> to vector<128x128xf32>
    %cst_33 = arith.constant dense<0.000000e+00> : vector<32x128xf32>
    %52 = tpu.matmul %47, %51, %cst_33 {dimension_numbers = #tpu.dot_dimension_numbers<[1], [0], [0], [1], [0, 0, 1, 1], [], []>} : vector<32x128xf32>, vector<128x128xf32>, vector<32x128xf32> -> vector<32x128xf32>
    %c1_34 = arith.constant 1 : index
    %c0_35 = arith.constant 0 : index
    %c0_36 = arith.constant 0 : index
    %53 = vector.load %arg4[%c1_34, %c0_35, %c0_36] : memref<3x128x128xf32, #tpu.memory_space<vmem>>, vector<1x128x128xf32>
    %54 = vector.shape_cast %53 : vector<1x128x128xf32> to vector<128x128xf32>
    %cst_37 = arith.constant dense<0.000000e+00> : vector<32x128xf32>
    %55 = tpu.matmul %45, %54, %cst_37 {dimension_numbers = #tpu.dot_dimension_numbers<[1], [0], [0], [1], [0, 0, 1, 1], [], []>} : vector<32x128xf32>, vector<128x128xf32>, vector<32x128xf32> -> vector<32x128xf32>
    %56 = arith.addf %52, %55 : vector<32x128xf32>
    %c2_38 = arith.constant 2 : index
    %c0_39 = arith.constant 0 : index
    %c0_40 = arith.constant 0 : index
    %57 = vector.load %arg4[%c2_38, %c0_39, %c0_40] : memref<3x128x128xf32, #tpu.memory_space<vmem>>, vector<1x128x128xf32>
    %58 = vector.shape_cast %57 : vector<1x128x128xf32> to vector<128x128xf32>
    %cst_41 = arith.constant dense<0.000000e+00> : vector<32x128xf32>
    %59 = tpu.matmul %49, %58, %cst_41 {dimension_numbers = #tpu.dot_dimension_numbers<[1], [0], [0], [1], [0, 0, 1, 1], [], []>} : vector<32x128xf32>, vector<128x128xf32>, vector<32x128xf32> -> vector<32x128xf32>
    %60 = arith.addf %56, %59 : vector<32x128xf32>
    %cst_42 = arith.constant dense<0.000000e+00> : vector<128xf32>
    %61 = vector.multi_reduction <add>, %60, %cst_42 [0] : vector<32x128xf32> to vector<128xf32>
    %62 = vector.shape_cast %61 : vector<128xf32> to vector<1x128xf32>
    %cst_43 = arith.constant dense<0.000000e+00> : vector<1x128xf32>
    %63 = tpu.matmul %62, %3, %cst_43 {dimension_numbers = #tpu.dot_dimension_numbers<[1], [0], [0], [1], [0, 0, 1, 1], [], []>} : vector<1x128xf32>, vector<128x128xf32>, vector<1x128xf32> -> vector<1x128xf32>
    %64 = arith.mulf %60, %60 : vector<32x128xf32>
    %cst_44 = arith.constant dense<0.000000e+00> : vector<128xf32>
    %65 = vector.multi_reduction <add>, %64, %cst_44 [0] : vector<32x128xf32> to vector<128xf32>
    %66 = vector.shape_cast %65 : vector<128xf32> to vector<1x128xf32>
    %cst_45 = arith.constant dense<0.000000e+00> : vector<1x128xf32>
    %67 = tpu.matmul %66, %3, %cst_45 {dimension_numbers = #tpu.dot_dimension_numbers<[1], [0], [0], [1], [0, 0, 1, 1], [], []>} : vector<1x128xf32>, vector<128x128xf32>, vector<1x128xf32> -> vector<1x128xf32>
    %cst_46 = arith.constant 0.001953125 : f32
    %68 = vector.broadcast %cst_46 : f32 to vector<1x128xf32>
    %69 = arith.mulf %63, %68 : vector<1x128xf32>
    %cst_47 = arith.constant 0.001953125 : f32
    %70 = vector.broadcast %cst_47 : f32 to vector<1x128xf32>
    %71 = arith.mulf %67, %70 : vector<1x128xf32>
    %72 = arith.mulf %69, %69 : vector<1x128xf32>
    %73 = arith.subf %71, %72 : vector<1x128xf32>
    %cst_48 = arith.constant 9.99999974E-6 : f32
    %74 = vector.broadcast %cst_48 : f32 to vector<1x128xf32>
    %75 = arith.addf %73, %74 : vector<1x128xf32>
    %76 = math.rsqrt %75 : vector<1x128xf32>
    %77 = arith.mulf %76, %4 : vector<1x128xf32>
    %78 = arith.mulf %69, %77 : vector<1x128xf32>
    %79 = arith.subf %5, %78 : vector<1x128xf32>
    %80 = vector.broadcast %77 : vector<1x128xf32> to vector<32x128xf32>
    %81 = arith.mulf %60, %80 : vector<32x128xf32>
    %82 = vector.broadcast %79 : vector<1x128xf32> to vector<32x128xf32>
    %83 = arith.addf %81, %82 : vector<32x128xf32>
    %84 = arith.addf %83, %0 : vector<32x128xf32>
    %cst_49 = arith.constant 0.000000e+00 : f32
    %85 = vector.broadcast %cst_49 : f32 to vector<32x128xf32>
    %86 = arith.maximumf %84, %85 : vector<32x128xf32>
    %c0_50 = arith.constant 0 : index
    %c0_51 = arith.constant 0 : index
    %87 = vector.load %arg8[%c0_50, %c0_51] : memref<32x128xf32, #tpu.memory_space<vmem>>, vector<32x128xf32>
    tpu.vector_store %arg8[%c0_50, %c0_51], %86 {strides = array<i32>} : memref<32x128xf32, #tpu.memory_space<vmem>>, vector<32x128xf32>,
    return
  }
}

</mosaic_0001>

<bundles_post_ra>
// kernel: tile.13
= control target key start
LH: loop header
LB: loop body
LE: loop exit
PB: predicated region body
PF: predicated region fallthrough
CT: control target
= control target key end

     0   :  { %s28_s0 = inlined_call_operand.vmem [shape: f32[8], index: 0, kind: input, shape index: {}]   ;;  %s29_s1 = inlined_call_operand.vmem [shape: f32[16,8], index: 1, kind: output, shape index: {}]  }
   0x1   :  { %v4_v0 = vld [vmem:[%s28_s0] ss:$0 sm:$0xff] }
   0x2   :  { %5 = vst [vmem:[%s29_s1] sm:$0xff] %v4_v0  ;;  %8 = vst [vmem:[%s29_s1 + $0x8] sm:$0xff] %v4_v0 }

// kernel: tile.14
= control target key start
LH: loop header
LB: loop body
LE: loop exit
PB: predicated region body
PF: predicated region fallthrough
CT: control target
= control target key end

     0   :  { %s131_s10 = smov 120   ;;  %s132_s11 = smov 104   ;;  %vm3_vm0 = vcmask 64512   ;;  %vm9_vm1 = vcmask 1048512   ;;  %vm15_vm2 = vcmask 982912   ;;  %vm21_vm3 = vcmask 917312   ;;  %s207_s0 = inlined_call_operand.vmem [shape: f32[16,8], index: 0, kind: input, shape index: {}]   ;;  %s208_s1 = inlined_call_operand.vmem [shape: f32[1,128], index: 1, kind: output, shape index: {}]  }
   0x1   :  { %v101_v0 = vld [vmem:[%s207_s0 + $0xf] sm:$0x1]   ;;  %v103_v1 = vld [vmem:[%s207_s0 + $0xd] sm:$0x1]   ;;  %v102_v2 = vld [vmem:[%s207_s0 + $0xe] sm:$0x1]  }
   0x2   :  { %7 = vrot.lane.b32.xlu0 %v101_v0, %s131_s10  ;;  %19 = vrot.lane.b32.xlu1 %v103_v1, %s132_s11  ;;  %v104_v3 = vld [vmem:[%s207_s0 + $0xc] sm:$0x1]   ;;  %s133_s16 = smov 112   ;;  %s134_s17 = smov 96   ;;  %v105_v4 = vld [vmem:[%s207_s0 + $0xb] sm:$0x1]  }
   0x3   :  { %v106_v5 = vld [vmem:[%s207_s0 + $0xa] sm:$0x1]   ;;  %v2_v6 = vld [vmem:[%s207_s0] sm:$0x1]   ;;  %s135_s24 = smov 88   ;;  %s136_s25 = smov 80  }
   0x4   :  { %4 = vst.msk [vmem:[#allocation0] sm:$0x1] %vm3_vm0, %v2_v6   ;;  %v107_v7 = vld [vmem:[%s207_s0 + $0x9] sm:$0x1]   ;;  %v108_v8 = vld [vmem:[%s207_s0 + $0x8] sm:$0x1]  }
   0x5   :  { %s137_s30 = smov 72   ;;  %s138_s2 = smov 64   ;;  %v109_v9 = vld [vmem:[%s207_s0 + $0x7] sm:$0x1]   ;;  %v110_v10 = vld [vmem:[%s207_s0 + $0x6] sm:$0x1]  }
   0x6   :  { %13 = vrot.lane.b32.xlu0 %v102_v2, %s133_s16  ;;  %25 = vrot.lane.b32.xlu1 %v104_v3, %s134_s17  ;;  %s139_s7 = smov 56   ;;  %s140_s8 = smov 48   ;;  %v111_v11 = vld [vmem:[%s207_s0 + $0x5] sm:$0x1]   ;;  %v112_v12 = vld [vmem:[%s207_s0 + $0x4] sm:$0x1]  }
   0x7   :  { %s141_s13 = smov 40   ;;  %s142_s14 = smov 32   ;;  %v113_v13 = vld [vmem:[%s207_s0 + $0x3] sm:$0x1]   ;;  %v114_v14 = vld [vmem:[%s207_s0 + $0x2] sm:$0x1]  }
   0x8   :  { %s143_s19 = smov 24   ;;  %s144_s20 = smov 16   ;;  %v115_v15 = vld [vmem:[%s207_s0 + $0x1] sm:$0x1]   ;;  %vm27_vm4 = vcmask 851712   ;;  %vm33_vm5 = vcmask 786112  }
   0x9   :  { %s145_s0 = smov 8   ;;  %vm39_vm6 = vcmask 720512   ;;  %vm45_vm7 = vcmask 654912   ;;  %vm51_vm8 = vcmask 589312   ;;  %vm57_vm9 = vcmask 523712  }
   0xa   :  { %31 = vrot.lane.b32.xlu0 %v105_v4, %s135_s24  ;;  %37 = vrot.lane.b32.xlu1 %v106_v5, %s136_s25  ;;  %vm63_vm10 = vcmask 458112   ;;  %vm69_vm11 = vcmask 392512   ;;  %vm75_vm12 = vcmask 326912   ;;  %vm81_vm13 = vcmask 261312  }
   0xb   :  { %vm87_vm14 = vcmask 195712   ;;  %vm93_vm15 = vcmask 130112  }
   0xe   :  { %43 = vrot.lane.b32.xlu0 %v107_v7, %s137_s30  ;;  %49 = vrot.lane.b32.xlu1 %v108_v8, %s138_s2 }
  0x12   :  { %55 = vrot.lane.b32.xlu0 %v109_v9, %s139_s7  ;;  %61 = vrot.lane.b32.xlu1 %v110_v10, %s140_s8 }
  0x16   :  { %67 = vrot.lane.b32.xlu0 %v111_v11, %s141_s13  ;;  %73 = vrot.lane.b32.xlu1 %v112_v12, %s142_s14 }
  0x1a   :  { %79 = vrot.lane.b32.xlu0 %v113_v13, %s143_s19  ;;  %85 = vrot.lane.b32.xlu1 %v114_v14, %s144_s20 }
  0x1e   :  { %91 = vrot.lane.b32.xlu0 %v115_v15, %s145_s0 }
  0x74   :  { %v8_v16 = vpop.permute.xlu0 %7   ;;  %v20_v17 = vpop.permute.xlu1 %19  }
  0x75   :  { %10 = vst.msk [vmem:[#allocation0] sm:$0x1] %vm9_vm1, %v8_v16  }
  0x78   :  { %v14_v18 = vpop.permute.xlu0 %13   ;;  %v26_v19 = vpop.permute.xlu1 %25  }
  0x79   :  { %16 = vst.msk [vmem:[#allocation0] sm:$0x1] %vm15_vm2, %v14_v18  }
  0x7a   :  { %22 = vst.msk [vmem:[#allocation0] sm:$0x1] %vm21_vm3, %v20_v17  }
  0x7b   :  { %28 = vst.msk [vmem:[#allocation0] sm:$0x1] %vm27_vm4, %v26_v19  }
  0x7c   :  { %v32_v20 = vpop.permute.xlu0 %31   ;;  %v38_v21 = vpop.permute.xlu1 %37  }
  0x7d   :  { %34 = vst.msk [vmem:[#allocation0] sm:$0x1] %vm33_vm5, %v32_v20  }
  0x7e   :  { %40 = vst.msk [vmem:[#allocation0] sm:$0x1] %vm39_vm6, %v38_v21  }
  0x80   :  { %v44_v22 = vpop.permute.xlu0 %43   ;;  %v50_v23 = vpop.permute.xlu1 %49  }
  0x81   :  { %46 = vst.msk [vmem:[#allocation0] sm:$0x1] %vm45_vm7, %v44_v22  }
  0x82   :  { %52 = vst.msk [vmem:[#allocation0] sm:$0x1] %vm51_vm8, %v50_v23  }
  0x84   :  { %v56_v24 = vpop.permute.xlu0 %55   ;;  %v62_v25 = vpop.permute.xlu1 %61  }
  0x85   :  { %58 = vst.msk [vmem:[#allocation0] sm:$0x1] %vm57_vm9, %v56_v24  }
  0x86   :  { %64 = vst.msk [vmem:[#allocation0] sm:$0x1] %vm63_vm10, %v62_v25  }
  0x88   :  { %v68_v26 = vpop.permute.xlu0 %67   ;;  %v74_v27 = vpop.permute.xlu1 %73  }
  0x89   :  { %70 = vst.msk [vmem:[#allocation0] sm:$0x1] %vm69_vm11, %v68_v26  }
  0x8a   :  { %76 = vst.msk [vmem:[#allocation0] sm:$0x1] %vm75_vm12, %v74_v27  }
  0x8c   :  { %v80_v28 = vpop.permute.xlu0 %79   ;;  %v86_v29 = vpop.permute.xlu1 %85  }
  0x8d   :  { %82 = vst.msk [vmem:[#allocation0] sm:$0x1] %vm81_vm13, %v80_v28  }
  0x8e   :  { %88 = vst.msk [vmem:[#allocation0] sm:$0x1] %vm87_vm14, %v86_v29  }
  0x90   :  { %v92_v30 = vpop.permute.xlu0 %91  }
  0x91   :  { %94 = vst.msk [vmem:[#allocation0] sm:$0x1] %vm93_vm15, %v92_v30  }
  0x98   :  { %v98_v31 = vld [vmem:[#allocation0] sm:$0x1] }
  0x99   :  { %100 = vst [vmem:[%s208_s1] sm:$0x1] %v98_v31 }

// kernel: block_forward.1
= control target key start
LH: loop header
LB: loop body
LE: loop exit
PB: predicated region body
PF: predicated region fallthrough
CT: control target
= control target key end

     0   :  { %v2059_v3 = vmov 0.0|0.0   ;;  %v63_v30 = vlaneseq  ;;  %vm2060_vm2 = vmmov 0   ;;  %s2735_s3 = inlined_call_operand.vmem [shape: f32[3,128,128], index: 3, kind: input, shape index: {}]   ;;  %s2736_s0 = inlined_call_operand.vmem [shape: f32[32,128], index: 0, kind: input, shape index: {}]   ;;  %s2737_s5 = inlined_call_operand.vmem [shape: f32[128,128], index: 5, kind: input, shape index: {}]   ;;  %s2738_s1 = inlined_call_operand.vmem [shape: f32[32,128], index: 1, kind: input, shape index: {}]   ;;  %s2739_s2 = inlined_call_operand.vmem [shape: f32[32,128], index: 2, kind: input, shape index: {}]   ;;  %s2740_s4 = inlined_call_operand.vmem [shape: f32[3,128,128], index: 4, kind: input, shape index: {}]   ;;  %s2741_s6 = inlined_call_operand.vmem [shape: f32[1,128], index: 6, kind: input, shape index: {}]   ;;  %s2742_s7 = inlined_call_operand.vmem [shape: f32[1,128], index: 7, kind: input, shape index: {}]   ;;  %s2743_s8 = inlined_call_operand.vmem [shape: f32[32,128], index: 8, kind: output, shape index: {}]  }
   0x1   :  { %v1127_v0 = vld [vmem:[%s2735_s3 + $0x80] sm:$0xff]  ;;  %v1128_v1 = vld [vmem:[%s2735_s3 + $0x88] sm:$0xff]  ;;  %v1129_v2 = vld [vmem:[%s2735_s3 + $0x90] sm:$0xff]  ;;  %1843 = vmatprep.subr.bf16.mxu1 %v2059_v3 }
   0x2   :  { %v1747_v4 = vpack.c.bf16 %v1128_v1, %v1127_v0  ;;  %v1130_v5 = vld [vmem:[%s2735_s3 + $0x98] sm:$0xff]  ;;  %v1131_v7 = vld [vmem:[%s2735_s3 + $0xa0] sm:$0xff]  ;;  %v1132_v8 = vld [vmem:[%s2735_s3 + $0xa8] sm:$0xff]  ;;  %v2192_v37 = vshrl.u32 %v63_v30, 7 }
   0x3   :  { %v1751_v6 = vpack.c.bf16 %v1130_v5, %v1129_v2  ;;  %v1755_v9 = vpack.c.bf16 %v1132_v8, %v1131_v7  ;;  %v2129_v10 = vld [vmem:[%s2736_s0] sm:$0xff]  ;;  %v1133_v11 = vld [vmem:[%s2735_s3 + $0xb0] sm:$0xff]  ;;  %v1134_v12 = vld [vmem:[%s2735_s3 + $0xb8] sm:$0xff] }
   0x4   :  { %1748 = vmatprep.subr.bf16.mxu0 %v1747_v4  ;;  %1411 = vmatprep.mubr.f32.mxu0 %v2129_v10  ;;  %v1759_v13 = vpack.c.bf16 %v1134_v12, %v1133_v11  ;;  %v1135_v14 = vld [vmem:[%s2735_s3 + $0xc0] sm:$0xff]  ;;  %v1136_v15 = vld [vmem:[%s2735_s3 + $0xc8] sm:$0xff]  ;;  %v1137_v17 = vld [vmem:[%s2735_s3 + $0xd0] sm:$0xff]  ;;  %v59_v40 = vrot.slane %v2129_v10, 7  ;;  %vm65_vm0 = vcmp.lt.s32.totalorder %v2192_v37, 1  ;;  %vm78_vm1 = vcmp.lt.s32.totalorder %v2192_v37, 7 }
   0x5   :  { %1750 = vmatpush3.bf16.msra.mxu0 %v1747_v4  ;;  %v1763_v16 = vpack.c.bf16 %v1136_v15, %v1135_v14  ;;  %v1138_v18 = vld [vmem:[%s2735_s3 + $0xd8] sm:$0xff]  ;;  %v1139_v20 = vld [vmem:[%s2735_s3 + $0xe0] sm:$0xff]  ;;  %v1140_v21 = vld [vmem:[%s2735_s3 + $0xe8] sm:$0xff] }
   0x6   :  { %1752 = vmatprep.subr.bf16.mxu0 %v1751_v6  ;;  %v1767_v19 = vpack.c.bf16 %v1138_v18, %v1137_v17  ;;  %v41_v22 = vld [vmem:[%s2737_s5] sm:$0xff]  ;;  %v42_v23 = vld [vmem:[%s2737_s5 + $0x8] sm:$0xff]  ;;  %v43_v24 = vld [vmem:[%s2737_s5 + $0x10] sm:$0xff]  ;;  %v1771_v25 = vpack.c.bf16 %v1140_v21, %v1139_v20 }
   0x7   :  { %v2165_v26 = vpack.c.bf16 %v42_v23, %v41_v22  ;;  %v44_v27 = vld [vmem:[%s2737_s5 + $0x18] sm:$0xff]  ;;  %v1141_v28 = vld [vmem:[%s2735_s3 + $0xf0] sm:$0xff]  ;;  %v45_v32 = vld [vmem:[%s2737_s5 + $0x20] sm:$0xff] }
   0x8   :  { %v1142_v29 = vld [vmem:[%s2735_s3 + $0xf8] sm:$0xff]  ;;  %v2177_v31 = vpack.c.bf16 %v44_v27, %v43_v24  ;;  %v46_v33 = vld [vmem:[%s2737_s5 + $0x28] sm:$0xff]  ;;  %v87_v35 = vld [vmem:[%s2735_s3] sm:$0xff] }
   0x9   :  { %1754 = vmatpush3.bf16.msra.mxu0 %v1751_v6  ;;  %1845 = vmatpush3.bf16.msra.mxu1 %v2165_v26  ;;  %v1775_v34 = vpack.c.bf16 %v1142_v29, %v1141_v28  ;;  %v88_v36 = vld [vmem:[%s2735_s3 + $0x8] sm:$0xff]  ;;  %v2197_v38 = vld [vmem:[%s2736_s0 + $0x18] sm:$0xff]  ;;  %v2200_v39 = vpack.c.bf16 %v46_v33, %v45_v32  ;;  %v89_v43 = vld [vmem:[%s2735_s3 + $0x10] sm:$0xff] }
   0xa   :  { %1756 = vmatprep.subr.bf16.mxu0 %v1755_v9  ;;  %1846 = vmatprep.subr.bf16.mxu1 %v2059_v3  ;;  %v1779_v41 = vpack.c.bf16 %v88_v36, %v87_v35  ;;  %v62_v42 = vrot.slane %v2197_v38, 7  ;;  %v90_v44 = vld [vmem:[%s2735_s3 + $0x18] sm:$0xff]  ;;  %v2216_v45 = vld [vmem:[%s2736_s0 + $0x8] sm:$0xff]  ;;  %v2222_v47 = vld [vmem:[%s2736_s0 + $0x10] sm:$0xff] }
   0xb   :  { %v1783_v46 = vpack.c.bf16 %v90_v44, %v89_v43  ;;  %v2227_v48 = vld [vmem:[%s2738_s1] sm:$0xff]  ;;  %v92_v51 = vld [vmem:[%s2735_s3 + $0x28] sm:$0xff]  ;;  %v93_v54 = vld [vmem:[%s2735_s3 + $0x30] sm:$0xff]  ;;  %v60_v5 = vrot.slane %v2216_v45, 7  ;;  %v61_v6 = vrot.slane %v2222_v47, 7  ;;  %v75_v14 = vrot.slane %v2216_v45, 1 }
   0xc   :  { %v69_v49 = vsel %vm65_vm0, %v62_v42, %v59_v40  ;;  %v91_v50 = vld [vmem:[%s2735_s3 + $0x20] sm:$0xff]  ;;  %v94_v55 = vld [vmem:[%s2735_s3 + $0x38] sm:$0xff]  ;;  %v96_v58 = vld [vmem:[%s2735_s3 + $0x48] sm:$0xff] }
   0xd   :  { %1758 = vmatpush3.bf16.msra.mxu0 %v1755_v9  ;;  %1848 = vmatpush3.bf16.msra.mxu1 %v2177_v31  ;;  %v70_v52 = vmul.f32 %v69_v49, %v2227_v48  ;;  %v1787_v53 = vpack.c.bf16 %v92_v51, %v91_v50  ;;  %v1791_v56 = vpack.c.bf16 %v94_v55, %v93_v54  ;;  %v95_v57 = vld [vmem:[%s2735_s3 + $0x40] sm:$0xff]  ;;  %v97_v60 = vld [vmem:[%s2735_s3 + $0x50] sm:$0xff]  ;;  %v98_v61 = vld [vmem:[%s2735_s3 + $0x58] sm:$0xff]  ;;  %v76_v54 = vrot.slane %v2222_v47, 1 }
   0xe   :  { %1760 = vmatprep.subr.bf16.mxu0 %v1759_v13  ;;  %1849 = vmatprep.subr.bf16.mxu1 %v2059_v3  ;;  %v1795_v59 = vpack.c.bf16 %v96_v58, %v95_v57  ;;  %v1799_v62 = vpack.c.bf16 %v98_v61, %v97_v60  ;;  %v99_v63 = vld [vmem:[%s2735_s3 + $0x60] sm:$0xff]  ;;  %v100_v0 = vld [vmem:[%s2735_s3 + $0x68] sm:$0xff]  ;;  %v101_v2 = vld [vmem:[%s2735_s3 + $0x70] sm:$0xff]  ;;  %v68_v11 = vsel %vm65_vm0, %v59_v40, %v60_v5  ;;  %v77_v55 = vrot.slane %v2197_v38, 1 }
   0xf   :  { %v1803_v1 = vpack.c.bf16 %v100_v0, %v99_v63  ;;  %v102_v4 = vld [vmem:[%s2735_s3 + $0x78] sm:$0xff]  ;;  %v1143_v8 = vld [vmem:[%s2735_s3 + $0x100] sm:$0xff]  ;;  %v1144_v9 = vld [vmem:[%s2735_s3 + $0x108] sm:$0xff]  ;;  %v67_v17 = vsel %vm65_vm0, %v60_v5, %v61_v6  ;;  %v66_v23 = vsel %vm65_vm0, %v61_v6, %v62_v42  ;;  %v80_v57 = vsel %vm78_vm1, %v75_v14, %v76_v54 }
  0x10   :  { %v1807_v7 = vpack.c.bf16 %v102_v4, %v101_v2  ;;  %v2286_v12 = vld [vmem:[%s2738_s1 + $0x8] sm:$0xff]  ;;  %v1811_v15 = vpack.c.bf16 %v1144_v9, %v1143_v8  ;;  %v1145_v18 = vld [vmem:[%s2735_s3 + $0x110] sm:$0xff]  ;;  %v2309_v22 = vld [vmem:[%s2738_s1 + $0x18] sm:$0xff]  ;;  %v79_v60 = vsel %vm78_vm1, %v76_v54, %v77_v55 }
  0x11   :  { %1762 = vmatpush3.bf16.msra.mxu0 %v1759_v13  ;;  %1851 = vmatpush3.bf16.msra.mxu1 %v2200_v39  ;;  %v74_v13 = vrot.slane %v2129_v10, 1  ;;  %v71_v20 = vmul.f32 %v68_v11, %v2286_v12  ;;  %v1147_v28 = vld [vmem:[%s2735_s3 + $0x120] sm:$0xff]  ;;  %v1148_v29 = vld [vmem:[%s2735_s3 + $0x128] sm:$0xff]  ;;  %v73_v30 = vmul.f32 %v66_v23, %v2309_v22  ;;  %v1150_v35 = vld [vmem:[%s2735_s3 + $0x138] sm:$0xff] }
  0x12   :  { %1764 = vmatprep.subr.bf16.mxu0 %v1763_v16  ;;  %1852 = vmatprep.subr.bf16.mxu1 %v2059_v3  ;;  %v1819_v33 = vpack.c.bf16 %v1148_v29, %v1147_v28  ;;  %v1151_v40 = vld [vmem:[%s2735_s3 + $0x140] sm:$0xff]  ;;  %v1153_v43 = vld [vmem:[%s2735_s3 + $0x150] sm:$0xff]  ;;  %v1154_v44 = vld [vmem:[%s2735_s3 + $0x158] sm:$0xff] }
  0x13   :  { %v81_v27 = vsel %vm78_vm1, %v74_v13, %v75_v14  ;;  %v1155_v49 = vld [vmem:[%s2735_s3 + $0x160] sm:$0xff]  ;;  %v1156_v50 = vld [vmem:[%s2735_s3 + $0x168] sm:$0xff]  ;;  %v2383_v63 = vld [vmem:[%s2739_s2 + $0x18] sm:$0xff]  ;;  %v82_v0 = vsel %vm78_vm1, %v77_v55, %v74_v13 }
  0x14   :  { %v1835_v51 = vpack.c.bf16 %v1156_v50, %v1155_v49  ;;  %v2369_v58 = vld [vmem:[%s2739_s2 + $0x8] sm:$0xff]  ;;  %v47_v10 = vld [vmem:[%s2737_s5 + $0x30] sm:$0xff]  ;;  %v48_v2 = vld [vmem:[%s2737_s5 + $0x38] sm:$0xff] }
  0x15   :  { %1766 = vmatpush3.bf16.msra.mxu0 %v1763_v16  ;;  %v2293_v16 = vld [vmem:[%s2738_s1 + $0x10] sm:$0xff]  ;;  %v84_v61 = vmul.f32 %v80_v57, %v2369_v58  ;;  %v2403_v4 = vpack.c.bf16 %v48_v2, %v47_v10  ;;  %v49_v5 = vld [vmem:[%s2737_s5 + $0x40] sm:$0xff]  ;;  %v50_v6 = vld [vmem:[%s2737_s5 + $0x48] sm:$0xff] }
  0x16   :  { %1768 = vmatprep.subr.bf16.mxu0 %v1767_v19  ;;  %v72_v21 = vmul.f32 %v67_v17, %v2293_v16  ;;  %v51_v8 = vld [vmem:[%s2737_s5 + $0x50] sm:$0xff]  ;;  %v52_v9 = vld [vmem:[%s2737_s5 + $0x58] sm:$0xff]  ;;  %v53_v13 = vld [vmem:[%s2737_s5 + $0x60] sm:$0xff] }
  0x17   :  { %1854 = vmatpush3.bf16.msra.mxu1 %v2403_v4  ;;  %v2427_v11 = vpack.c.bf16 %v52_v9, %v51_v8  ;;  %v54_v14 = vld [vmem:[%s2737_s5 + $0x68] sm:$0xff]  ;;  %v55_v17 = vld [vmem:[%s2737_s5 + $0x70] sm:$0xff]  ;;  %v1159_v57 = vld [vmem:[%s2740_s4 + $0x80] sm:$0xff] }
  0x18   :  { %1855 = vmatprep.subr.bf16.mxu1 %v2059_v3  ;;  %v1163_v10 = vld [vmem:[%s2740_s4 + $0xa0] sm:$0xff]  ;;  %v1164_v2 = vld [vmem:[%s2740_s4 + $0xa8] sm:$0xff]  ;;  %v1166_v8 = vld [vmem:[%s2740_s4 + $0xb8] sm:$0xff] }
  0x19   :  { %1770 = vmatpush3.bf16.msra.mxu0 %v1767_v19  ;;  %v1146_v19 = vld [vmem:[%s2735_s3 + $0x118] sm:$0xff] }
  0x1a   :  { %1772 = vmatprep.subr.bf16.mxu0 %v1771_v25  ;;  %v1815_v24 = vpack.c.bf16 %v1146_v19, %v1145_v18  ;;  %v56_v18 = vld [vmem:[%s2737_s5 + $0x78] sm:$0xff] }
  0x1b   :  { %v2450_v19 = vpack.c.bf16 %v56_v18, %v55_v17  ;;  %v1169_v18 = vld [vmem:[%s2740_s4 + $0xd0] sm:$0xff] }
  0x1d   :  { %1774 = vmatpush3.bf16.msra.mxu0 %v1771_v25  ;;  %v2318_v25 = vld [vmem:[%s2739_s2] sm:$0xff] }
  0x1e   :  { %1776 = vmatprep.subr.bf16.mxu0 %v1775_v34  ;;  %v83_v32 = vmul.f32 %v81_v27, %v2318_v25 }
  0x21   :  { %1778 = vmatpush3.bf16.msra.mxu0 %v1775_v34  ;;  %v1149_v34 = vld [vmem:[%s2735_s3 + $0x130] sm:$0xff] }
  0x22   :  { %1780 = vmatprep.subr.bf16.mxu0 %v1779_v41  ;;  %v1823_v36 = vpack.c.bf16 %v1150_v35, %v1149_v34 }
  0x24   :  { %1412 = vmatmul.mubr.f32.vlgmr.msra.gmra.mrb[0].mxu0 %v2216_v45 }
  0x25   :  { %1782 = vmatpush3.bf16.msra.mxu0 %v1779_v41  ;;  %1414 = vmatprep.mubr.f32.mxu0 %v2222_v47  ;;  %v1152_v41 = vld [vmem:[%s2735_s3 + $0x148] sm:$0xff] }
  0x26   :  { %1784 = vmatprep.subr.bf16.mxu0 %v1783_v46  ;;  %v1827_v42 = vpack.c.bf16 %v1152_v41, %v1151_v40 }
  0x28   :  { %1415 = vmatmul.mubr.f32.gmra.mrb[2].mxu0 %v2197_v38 }
  0x29   :  { %1786 = vmatpush3.bf16.msra.mxu0 %v1783_v46  ;;  %1449 = vmatprep.mubr.f32.mxu0 %v70_v52  ;;  %v1831_v46 = vpack.c.bf16 %v1154_v44, %v1153_v43  ;;  %v1157_v52 = vld [vmem:[%s2735_s3 + $0x170] sm:$0xff] }
  0x2a   :  { %1788 = vmatprep.subr.bf16.mxu0 %v1787_v53 }
  0x2d   :  { %1790 = vmatpush3.bf16.msra.mxu0 %v1787_v53  ;;  %v1158_v53 = vld [vmem:[%s2735_s3 + $0x178] sm:$0xff] }
  0x2e   :  { %1792 = vmatprep.subr.bf16.mxu0 %v1791_v56 }
  0x31   :  { %1794 = vmatpush3.bf16.msra.mxu0 %v1791_v56  ;;  %v1839_v56 = vpack.c.bf16 %v1158_v53, %v1157_v52 }
  0x32   :  { %1796 = vmatprep.subr.bf16.mxu0 %v1795_v59 }
  0x35   :  { %1798 = vmatpush3.bf16.msra.mxu0 %v1795_v59  ;;  %v2374_v59 = vld [vmem:[%s2739_s2 + $0x10] sm:$0xff] }
  0x36   :  { %1800 = vmatprep.subr.bf16.mxu0 %v1799_v62 }
  0x39   :  { %1802 = vmatpush3.bf16.msra.mxu0 %v1799_v62  ;;  %v85_v62 = vmul.f32 %v79_v60, %v2374_v59  ;;  %v1160_v60 = vld [vmem:[%s2740_s4 + $0x88] sm:$0xff] }
  0x3a   :  { %1804 = vmatprep.subr.bf16.mxu0 %v1803_v1 }
  0x3d   :  { %1806 = vmatpush3.bf16.msra.mxu0 %v1803_v1  ;;  %v86_v1 = vmul.f32 %v82_v0, %v2383_v63  ;;  %v1162_v0 = vld [vmem:[%s2740_s4 + $0x98] sm:$0xff] }
  0x3e   :  { %1808 = vmatprep.subr.bf16.mxu0 %v1807_v7 }
  0x41   :  { %1810 = vmatpush3.bf16.msra.mxu0 %v1807_v7  ;;  %v2415_v7 = vpack.c.bf16 %v50_v6, %v49_v5  ;;  %v1899_v5 = vpack.c.bf16 %v1164_v2, %v1163_v10  ;;  %v1165_v6 = vld [vmem:[%s2740_s4 + $0xb0] sm:$0xff] }
  0x42   :  { %1812 = vmatprep.subr.bf16.mxu0 %v1811_v15  ;;  %v1903_v9 = vpack.c.bf16 %v1166_v8, %v1165_v6 }
  0x43   :  { %1857 = vmatpush3.bf16.msra.mxu1 %v2415_v7 }
  0x44   :  { %1450 = vmatmul.mubr.f32.vlgmr.msra.gmra.mrb[0].mxu0 %v71_v20  ;;  %1858 = vmatprep.subr.bf16.mxu1 %v2059_v3  ;;  %v2061_v20 = vmov 0.0  }
  0x45   :  { %1814 = vmatpush3.bf16.msra.mxu0 %v1811_v15  ;;  %1452 = vmatprep.mubr.f32.mxu0 %v72_v21  ;;  %v2439_v15 = vpack.c.bf16 %v54_v14, %v53_v13  ;;  %v1167_v13 = vld [vmem:[%s2740_s4 + $0xc0] sm:$0xff]  ;;  %v1168_v14 = vld [vmem:[%s2740_s4 + $0xc8] sm:$0xff] }
  0x46   :  { %1816 = vmatprep.subr.bf16.mxu0 %v1815_v24  ;;  %1525 = vmatprep.mubr.msk.f32.mxu1 %vm2060_vm2, %v2061_v20  ;;  %v1907_v17 = vpack.c.bf16 %v1168_v14, %v1167_v13 }
  0x47   :  { %1860 = vmatpush3.bf16.msra.mxu1 %v2427_v11 }
  0x48   :  { %1453 = vmatmul.mubr.f32.gmra.mrb[2].mxu0 %v73_v30  ;;  %1861 = vmatprep.subr.bf16.mxu1 %v2059_v3 }
  0x49   :  { %1818 = vmatpush3.bf16.msra.mxu0 %v1815_v24  ;;  %1487 = vmatprep.mubr.f32.mxu0 %v83_v32 }
  0x4a   :  { %1820 = vmatprep.subr.bf16.mxu0 %v1819_v33 }
  0x4b   :  { %1863 = vmatpush3.bf16.msra.mxu1 %v2439_v15 }
  0x4c   :  { %1864 = vmatprep.subr.bf16.mxu1 %v2059_v3 }
  0x4d   :  { %1822 = vmatpush3.bf16.msra.mxu0 %v1819_v33 }
  0x4e   :  { %1824 = vmatprep.subr.bf16.mxu0 %v1823_v36 }
  0x4f   :  { %1866 = vmatpush3.bf16.msra.mxu1 %v2450_v19 }
  0x50   :  { %1867 = vmatprep.subr.bf16.mxu1 %v2059_v3 }
  0x51   :  { %1826 = vmatpush3.bf16.msra.mxu0 %v1823_v36 }
  0x52   :  { %1828 = vmatprep.subr.bf16.mxu0 %v1827_v42 }
  0x55   :  { %1830 = vmatpush3.bf16.msra.mxu0 %v1827_v42 }
  0x56   :  { %1832 = vmatprep.subr.bf16.mxu0 %v1831_v46 }
  0x59   :  { %1834 = vmatpush3.bf16.msra.mxu0 %v1831_v46 }
  0x5a   :  { %1836 = vmatprep.subr.bf16.mxu0 %v1835_v51 }
  0x5d   :  { %1838 = vmatpush3.bf16.msra.mxu0 %v1835_v51 }
  0x5e   :  { %1840 = vmatprep.subr.bf16.mxu0 %v1839_v56 }
  0x61   :  { %1842 = vmatpush3.bf16.msra.mxu0 %v1839_v56 }
  0x62   :  { %1987 = vmatprep.subr.bf16.mxu0 %v2059_v3 }
  0x64   :  { %1488 = vmatmul.mubr.f32.vlgmr.msra.gmra.mrb[0].mxu0 %v84_v61  ;;  %v1891_v61 = vpack.c.bf16 %v1160_v60, %v1159_v57 }
  0x65   :  { %1490 = vmatprep.mubr.f32.mxu0 %v85_v62  ;;  %1989 = vmatpush3.bf16.msra.mxu0 %v2165_v26  ;;  %v1161_v62 = vld [vmem:[%s2740_s4 + $0x90] sm:$0xff] }
  0x66   :  { %1990 = vmatprep.subr.bf16.mxu0 %v2059_v3 }
  0x68   :  { %1491 = vmatmul.mubr.f32.gmra.mrb[2].mxu0 %v86_v1  ;;  %v1895_v1 = vpack.c.bf16 %v1162_v0, %v1161_v62 }
  0x69   :  { %1992 = vmatpush3.bf16.msra.mxu0 %v2177_v31  ;;  %1709 = vmatprep.mubr.msk.f32.mxu0 %vm2060_vm2, %v2061_v20 }
  0x6a   :  { %1993 = vmatprep.subr.bf16.mxu0 %v2059_v3 }
  0x6d   :  { %1995 = vmatpush3.bf16.msra.mxu0 %v2200_v39 }
  0x6e   :  { %1996 = vmatprep.subr.bf16.mxu0 %v2059_v3 }
  0x71   :  { %1998 = vmatpush3.bf16.msra.mxu0 %v2403_v4 }
  0x72   :  { %1999 = vmatprep.subr.bf16.mxu0 %v2059_v3 }
  0x75   :  { %2001 = vmatpush3.bf16.msra.mxu0 %v2415_v7 }
  0x76   :  { %2002 = vmatprep.subr.bf16.mxu0 %v2059_v3 }
  0x79   :  { %2004 = vmatpush3.bf16.msra.mxu0 %v2427_v11 }
  0x7a   :  { %2005 = vmatprep.subr.bf16.mxu0 %v2059_v3 }
  0x7d   :  { %2007 = vmatpush3.bf16.msra.mxu0 %v2439_v15 }
  0x7e   :  { %2008 = vmatprep.subr.bf16.mxu0 %v2059_v3 }
  0x81   :  { %2010 = vmatpush3.bf16.msra.mxu0 %v2450_v19 }
  0x82   :  { %2011 = vmatprep.subr.bf16.mxu0 %v2059_v3 }
 0x137   :  { %v2461_v21 = vpop.f32.mrb[0].mxu0 }
 0x138   :  { %v476_v23 = vmul.f32 %v2461_v21, %v2461_v21  ;;  %v2465_v24 = vpop.f32.mrb[1].mxu0 }
 0x139   :  { %v396_v27 = vadd.f32 %v2461_v21, %v2465_v24  ;;  %v475_v28 = vmul.f32 %v2465_v24, %v2465_v24 }
 0x13b   :  { %v479_v29 = vadd.f32 %v476_v23, %v475_v28  ;;  %v2471_v30 = vpop.f32.mrb[2].mxu0  ;;  %v1170_v23 = vld [vmem:[%s2740_s4 + $0xd8] sm:$0xff]  ;;  %v1171_v28 = vld [vmem:[%s2740_s4 + $0xe0] sm:$0xff] }
 0x13c   :  { %v2473_v32 = vpop.f32.mrb[3].mxu0  ;;  %v478_v35 = vmul.f32 %v2471_v30, %v2471_v30 }
 0x13d   :  { %v397_v33 = vadd.f32 %v396_v27, %v2473_v32  ;;  %v477_v34 = vmul.f32 %v2473_v32, %v2473_v32  ;;  %v1911_v27 = vpack.c.bf16 %v1170_v23, %v1169_v18  ;;  %v616_v18 = vld [vmem:[%s2740_s4 + $0x18] sm:$0xff] }
 0x13f   :  { %v398_v36 = vadd.f32 %v2471_v30, %v397_v33  ;;  %v480_v40 = vadd.f32 %v479_v29, %v477_v34  ;;  %v1172_v29 = vld [vmem:[%s2740_s4 + $0xe8] sm:$0xff]  ;;  %v1173_v33 = vld [vmem:[%s2740_s4 + $0xf0] sm:$0xff] }
 0x140   :  { %v1915_v34 = vpack.c.bf16 %v1172_v29, %v1171_v28 }
 0x141   :  { %v399_v41 = vrot.slane %v398_v36, 4  ;;  %v481_v42 = vadd.f32 %v480_v40, %v478_v35  ;;  %v1174_v35 = vld [vmem:[%s2740_s4 + $0xf8] sm:$0xff]  ;;  %v613_v40 = vld [vmem:[%s2740_s4] sm:$0xff] }
 0x143   :  { %v400_v43 = vadd.f32 %v399_v41, %v398_v36  ;;  %v482_v51 = vrot.slane %v481_v42, 4  ;;  %v1919_v36 = vpack.c.bf16 %v1174_v35, %v1173_v33  ;;  %v614_v41 = vld [vmem:[%s2740_s4 + $0x8] sm:$0xff]  ;;  %v617_v35 = vld [vmem:[%s2740_s4 + $0x20] sm:$0xff] }
 0x145   :  { %v401_v44 = vrot.slane %v400_v43, 2  ;;  %v483_v52 = vadd.f32 %v482_v51, %v481_v42  ;;  %v1923_v42 = vpack.c.bf16 %v614_v41, %v613_v40 }
 0x147   :  { %v402_v46 = vadd.f32 %v401_v44, %v400_v43  ;;  %v484_v53 = vrot.slane %v483_v52, 2 }
 0x149   :  { %v403_v49 = vrot.slane %v402_v46, 1  ;;  %v485_v54 = vadd.f32 %v484_v53, %v483_v52 }
 0x14b   :  { %v404_v50 = vadd.f32 %v403_v49, %v402_v46  ;;  %v486_v55 = vrot.slane %v485_v54, 1 }
 0x14d   :  { %1526 = vmatmul.mubr.f32.vlgmr.msra.gmra.mrb[0].mxu1 %v404_v50  ;;  %v487_v56 = vadd.f32 %v486_v55, %v485_v54  ;;  %v2555_v55 = vld [vmem:[%s2741_s6] sm:$0x1] }
 0x14e   :  { %1869 = vmatpush3.bf16.msra.mxu1 %v2165_v26  ;;  %1560 = vmatprep.mubr.msk.f32.mxu1 %vm2060_vm2, %v2061_v20 }
 0x14f   :  { %1870 = vmatprep.subr.bf16.mxu1 %v2059_v3 }
 0x152   :  { %1872 = vmatpush3.bf16.msra.mxu1 %v2177_v31 }
 0x153   :  { %1873 = vmatprep.subr.bf16.mxu1 %v2059_v3 }
 0x156   :  { %1875 = vmatpush3.bf16.msra.mxu1 %v2200_v39 }
 0x157   :  { %1876 = vmatprep.subr.bf16.mxu1 %v2059_v3 }
 0x15a   :  { %1878 = vmatpush3.bf16.msra.mxu1 %v2403_v4 }
 0x15b   :  { %1879 = vmatprep.subr.bf16.mxu1 %v2059_v3 }
 0x15e   :  { %1881 = vmatpush3.bf16.msra.mxu1 %v2415_v7 }
 0x15f   :  { %1882 = vmatprep.subr.bf16.mxu1 %v2059_v3 }
 0x162   :  { %1884 = vmatpush3.bf16.msra.mxu1 %v2427_v11 }
 0x163   :  { %1885 = vmatprep.subr.bf16.mxu1 %v2059_v3 }
 0x166   :  { %1887 = vmatpush3.bf16.msra.mxu1 %v2439_v15 }
 0x167   :  { %1888 = vmatprep.subr.bf16.mxu1 %v2059_v3 }
 0x16a   :  { %1890 = vmatpush3.bf16.msra.mxu1 %v2450_v19 }
 0x16b   :  { %1892 = vmatprep.subr.bf16.mxu1 %v1891_v61 }
 0x16d   :  { %1561 = vmatmul.mubr.f32.vlgmr.msra.gmra.mrb[2].mxu1 %v487_v56  ;;  %v2558_v56 = vsub.s32 0, %v2192_v37  ;;  %v623_v37 = vld [vmem:[%s2740_s4 + $0x50] sm:$0xff] }
 0x16e   :  { %1894 = vmatpush3.bf16.msra.mxu1 %v1891_v61  ;;  %v2564_v61 = vld [vmem:[%s2742_s7] sm:$0x1] }
 0x16f   :  { %1896 = vmatprep.subr.bf16.mxu1 %v1895_v1 }
 0x172   :  { %1898 = vmatpush3.bf16.msra.mxu1 %v1895_v1 }
 0x173   :  { %1900 = vmatprep.subr.bf16.mxu1 %v1899_v5 }
 0x176   :  { %1902 = vmatpush3.bf16.msra.mxu1 %v1899_v5 }
 0x177   :  { %1904 = vmatprep.subr.bf16.mxu1 %v1903_v9 }
 0x17a   :  { %1906 = vmatpush3.bf16.msra.mxu1 %v1903_v9 }
 0x17b   :  { %1908 = vmatprep.subr.bf16.mxu1 %v1907_v17 }
 0x17e   :  { %1910 = vmatpush3.bf16.msra.mxu1 %v1907_v17  ;;  %v615_v17 = vld [vmem:[%s2740_s4 + $0x10] sm:$0xff] }
 0x17f   :  { %1912 = vmatprep.subr.bf16.mxu1 %v1911_v27  ;;  %v1927_v28 = vpack.c.bf16 %v616_v18, %v615_v17  ;;  %v628_v17 = vld [vmem:[%s2740_s4 + $0x78] sm:$0xff] }
 0x182   :  { %1914 = vmatpush3.bf16.msra.mxu1 %v1911_v27 }
 0x183   :  { %1916 = vmatprep.subr.bf16.mxu1 %v1915_v34 }
 0x186   :  { %1918 = vmatpush3.bf16.msra.mxu1 %v1915_v34 }
 0x187   :  { %1920 = vmatprep.subr.bf16.mxu1 %v1919_v36 }
 0x18a   :  { %1922 = vmatpush3.bf16.msra.mxu1 %v1919_v36  ;;  %v618_v36 = vld [vmem:[%s2740_s4 + $0x28] sm:$0xff] }
 0x18b   :  { %1924 = vmatprep.subr.bf16.mxu1 %v1923_v42 }
 0x220   :  { %v471_v43 = vpop.f32.mrb[0].mxu1 }
 0x221   :  { %v1527_v44 = vpop.f32.mrb[1].mxu1  ;;  %v558_v46 = vmul.f32 0.001953125, %v471_v43 }
 0x223   :  { %v560_v50 = vmul.f32 %v558_v46, %v558_v46 }
 0x240   :  { %v554_v49 = vpop.f32.mrb[2].mxu1 }
 0x241   :  { %v559_v51 = vmul.f32 0.001953125, %v554_v49  ;;  %v1562_v52 = vpop.f32.mrb[3].mxu1 }
 0x243   :  { %v561_v53 = vsub.f32 %v559_v51, %v560_v50  ;;  %v1931_v51 = vpack.c.bf16 %v618_v36, %v617_v35 }
 0x245   :  { %v562_v54 = vadd.f32 1e-05, %v561_v53 }
 0x247   :  { %2054 = vrsqrt.f32 %v562_v54  ;;  %v620_v54 = vld [vmem:[%s2740_s4 + $0x38] sm:$0xff] }
 0x251   :  { %v2055_v57 = vpop.eup %2054 }
 0x252   :  { %v564_v60 = vmul.f32 %v2055_v57, %v2555_v55 }
 0x254   :  { %v565_v62 = vmul.f32 %v564_v60, %v558_v46  ;;  %v570_v0 = vrot.slane %v564_v60, %v2558_v56 }
 0x256   :  { %v566_v1 = vsub.f32 %v2564_v61, %v565_v62  ;;  %v571_v10 = vmul.f32 %v570_v0, %v2465_v24  ;;  %v572_v2 = vmul.f32 %v2461_v21, %v570_v0  ;;  %v573_v5 = vmul.f32 %v570_v0, %v2473_v32 }
 0x257   :  { %v574_v6 = vmul.f32 %v2471_v30, %v570_v0 }
 0x258   :  { %v579_v8 = vrot.slane %v566_v1, %v2558_v56  ;;  %v621_v1 = vld [vmem:[%s2740_s4 + $0x40] sm:$0xff] }
 0x25a   :  { %v581_v9 = vadd.f32 %v579_v8, %v571_v10  ;;  %v582_v13 = vadd.f32 %v579_v8, %v572_v2  ;;  %v583_v14 = vadd.f32 %v579_v8, %v573_v5  ;;  %v584_v24 = vadd.f32 %v579_v8, %v574_v6  ;;  %v622_v10 = vld [vmem:[%s2740_s4 + $0x48] sm:$0xff]  ;;  %v624_v5 = vld [vmem:[%s2740_s4 + $0x58] sm:$0xff]  ;;  %v625_v8 = vld [vmem:[%s2740_s4 + $0x60] sm:$0xff] }
 0x25b   :  { %v1939_v2 = vpack.c.bf16 %v622_v10, %v621_v1  ;;  %v1943_v6 = vpack.c.bf16 %v624_v5, %v623_v37 }
 0x25c   :  { %v585_v23 = vmax.f32 %v581_v9, 0.0  ;;  %v586_v21 = vmax.f32 %v582_v13, 0.0  ;;  %v587_v27 = vmax.f32 %v583_v14, 0.0  ;;  %v588_v32 = vmax.f32 %v584_v24, 0.0  ;;  %v626_v9 = vld [vmem:[%s2740_s4 + $0x68] sm:$0xff]  ;;  %v627_v14 = vld [vmem:[%s2740_s4 + $0x70] sm:$0xff] }
 0x25d   :  { %v1947_v13 = vpack.c.bf16 %v626_v9, %v625_v8  ;;  %v1951_v18 = vpack.c.bf16 %v628_v17, %v627_v14  ;;  %v1175_v24 = vld [vmem:[%s2740_s4 + $0x100] sm:$0xff] }
 0x25e   :  { %v589_v30 = vrot.slane %v585_v23, 7  ;;  %v601_v29 = vrot.slane %v585_v23, 1  ;;  %1595 = vmatprep.mubr.f32.mxu1 %v585_v23  ;;  %v590_v33 = vrot.slane %v586_v21, 7  ;;  %v591_v34 = vrot.slane %v587_v27, 7  ;;  %v1176_v23 = vld [vmem:[%s2740_s4 + $0x108] sm:$0xff] }
 0x25f   :  { %1596 = vmatmul.mubr.f32.vlgmr.msra.gmra.mrb[4].mxu1 %v586_v21  ;;  %v603_v40 = vrot.slane %v587_v27, 1  ;;  %v592_v41 = vrot.slane %v588_v32, 7  ;;  %v604_v43 = vrot.slane %v588_v32, 1  ;;  %v602_v44 = vrot.slane %v586_v21, 1 }
 0x260   :  { %1926 = vmatpush3.bf16.msra.mxu1 %v1923_v42  ;;  %1598 = vmatprep.mubr.f32.mxu1 %v587_v27  ;;  %v595_v46 = vsel %vm65_vm0, %v589_v30, %v590_v33  ;;  %v594_v49 = vsel %vm65_vm0, %v590_v33, %v591_v34  ;;  %v619_v42 = vld [vmem:[%s2740_s4 + $0x30] sm:$0xff]  ;;  %v1955_v21 = vpack.c.bf16 %v1176_v23, %v1175_v24  ;;  %v1179_v33 = vld [vmem:[%s2740_s4 + $0x120] sm:$0xff] }
 0x261   :  { %1928 = vmatprep.subr.bf16.mxu1 %v1927_v28  ;;  %v596_v50 = vsel %vm65_vm0, %v592_v41, %v589_v30  ;;  %v593_v52 = vsel %vm65_vm0, %v591_v34, %v592_v41  ;;  %v607_v57 = vsel %vm78_vm1, %v601_v29, %v602_v44  ;;  %v2604_v60 = vsel %vm78_vm1, %v602_v44, %v603_v40  ;;  %v1177_v27 = vld [vmem:[%s2740_s4 + $0x110] sm:$0xff]  ;;  %v1180_v34 = vld [vmem:[%s2740_s4 + $0x128] sm:$0xff] }
 0x262   :  { %v597_v53 = vmul.f32 %v596_v50, %v2227_v48  ;;  %v2608_v62 = vsel %vm78_vm1, %v603_v40, %v604_v43  ;;  %v2612_v48 = vsel %vm78_vm1, %v604_v43, %v601_v29  ;;  %v1935_v0 = vpack.c.bf16 %v620_v54, %v619_v42  ;;  %v1182_v40 = vld [vmem:[%s2740_s4 + $0x138] sm:$0xff]  ;;  %v1185_v44 = vld [vmem:[%s2740_s4 + $0x150] sm:$0xff]  ;;  %v1187_v50 = vld [vmem:[%s2740_s4 + $0x160] sm:$0xff] }
 0x263   :  { %1599 = vmatmul.mubr.f32.gmra.mrb[6].mxu1 %v588_v32  ;;  %v1178_v32 = vld [vmem:[%s2740_s4 + $0x118] sm:$0xff]  ;;  %v599_v29 = vmul.f32 %v594_v49, %v2293_v16  ;;  %v600_v35 = vmul.f32 %v593_v52, %v2309_v22  ;;  %v1963_v36 = vpack.c.bf16 %v1180_v34, %v1179_v33  ;;  %v1181_v16 = vld [vmem:[%s2740_s4 + $0x130] sm:$0xff]  ;;  %v1183_v22 = vld [vmem:[%s2740_s4 + $0x140] sm:$0xff]  ;;  %v612_v1 = vmul.f32 %v2612_v48, %v2383_v63 }
 0x264   :  { %1930 = vmatpush3.bf16.msra.mxu1 %v1927_v28  ;;  %1633 = vmatprep.mubr.f32.mxu1 %v597_v53  ;;  %v598_v28 = vmul.f32 %v595_v46, %v2286_v12  ;;  %v1959_v30 = vpack.c.bf16 %v1178_v32, %v1177_v27  ;;  %v609_v12 = vmul.f32 %v607_v57, %v2318_v25  ;;  %v1184_v25 = vld [vmem:[%s2740_s4 + $0x148] sm:$0xff]  ;;  %v1186_v46 = vld [vmem:[%s2740_s4 + $0x158] sm:$0xff]  ;;  %v1189_v53 = vld [vmem:[%s2740_s4 + $0x170] sm:$0xff] }
 0x265   :  { %1932 = vmatprep.subr.bf16.mxu1 %v1931_v51  ;;  %v1967_v41 = vpack.c.bf16 %v1182_v40, %v1181_v16  ;;  %v1971_v43 = vpack.c.bf16 %v1184_v25, %v1183_v22  ;;  %v1975_v49 = vpack.c.bf16 %v1186_v46, %v1185_v44  ;;  %v1190_v42 = vld [vmem:[%s2740_s4 + $0x178] sm:$0xff]  ;;  %v610_v57 = vmul.f32 %v2604_v60, %v2369_v58 }
 0x266   :  { %v1983_v54 = vpack.c.bf16 %v1190_v42, %v1189_v53 }
 0x268   :  { %1934 = vmatpush3.bf16.msra.mxu1 %v1931_v51  ;;  %v1188_v51 = vld [vmem:[%s2740_s4 + $0x168] sm:$0xff] }
 0x269   :  { %1936 = vmatprep.subr.bf16.mxu1 %v1935_v0  ;;  %v1979_v52 = vpack.c.bf16 %v1188_v51, %v1187_v50  ;;  %v2058_v50 = vld [vmem:[%s2736_s0] sm:$0xff] }
 0x26c   :  { %1938 = vmatpush3.bf16.msra.mxu1 %v1935_v0  ;;  %v611_v0 = vmul.f32 %v2608_v62, %v2374_v59 }
 0x26d   :  { %1940 = vmatprep.subr.bf16.mxu1 %v1939_v2 }
 0x270   :  { %1942 = vmatpush3.bf16.msra.mxu1 %v1939_v2 }
 0x271   :  { %1944 = vmatprep.subr.bf16.mxu1 %v1943_v6 }
 0x274   :  { %1946 = vmatpush3.bf16.msra.mxu1 %v1943_v6 }
 0x275   :  { %1948 = vmatprep.subr.bf16.mxu1 %v1947_v13 }
 0x278   :  { %1950 = vmatpush3.bf16.msra.mxu1 %v1947_v13 }
 0x279   :  { %1952 = vmatprep.subr.bf16.mxu1 %v1951_v18 }
 0x27c   :  { %1954 = vmatpush3.bf16.msra.mxu1 %v1951_v18 }
 0x27d   :  { %1956 = vmatprep.subr.bf16.mxu1 %v1955_v21 }
 0x27f   :  { %1634 = vmatmul.mubr.f32.vlgmr.msra.gmra.mrb[4].mxu1 %v598_v28 }
 0x280   :  { %1636 = vmatprep.mubr.f32.mxu1 %v599_v29  ;;  %1958 = vmatpush3.bf16.msra.mxu1 %v1955_v21 }
 0x281   :  { %1960 = vmatprep.subr.bf16.mxu1 %v1959_v30 }
 0x283   :  { %1637 = vmatmul.mubr.f32.gmra.mrb[6].mxu1 %v600_v35 }
 0x284   :  { %1962 = vmatpush3.bf16.msra.mxu1 %v1959_v30  ;;  %1671 = vmatprep.mubr.f32.mxu1 %v609_v12 }
 0x285   :  { %1964 = vmatprep.subr.bf16.mxu1 %v1963_v36 }
 0x288   :  { %1966 = vmatpush3.bf16.msra.mxu1 %v1963_v36 }
 0x289   :  { %1968 = vmatprep.subr.bf16.mxu1 %v1967_v41 }
 0x28c   :  { %1970 = vmatpush3.bf16.msra.mxu1 %v1967_v41 }
 0x28d   :  { %1972 = vmatprep.subr.bf16.mxu1 %v1971_v43 }
 0x290   :  { %1974 = vmatpush3.bf16.msra.mxu1 %v1971_v43 }
 0x291   :  { %1976 = vmatprep.subr.bf16.mxu1 %v1975_v49 }
 0x294   :  { %1978 = vmatpush3.bf16.msra.mxu1 %v1975_v49 }
 0x295   :  { %1980 = vmatprep.subr.bf16.mxu1 %v1979_v52 }
 0x298   :  { %1982 = vmatpush3.bf16.msra.mxu1 %v1979_v52 }
 0x299   :  { %1984 = vmatprep.subr.bf16.mxu1 %v1983_v54 }
 0x29c   :  { %1986 = vmatpush3.bf16.msra.mxu1 %v1983_v54 }
 0x29f   :  { %1672 = vmatmul.mubr.f32.vlgmr.msra.gmra.mrb[4].mxu1 %v610_v57 }
 0x2a0   :  { %1674 = vmatprep.mubr.f32.mxu1 %v611_v0 }
 0x2a3   :  { %1675 = vmatmul.mubr.f32.gmra.mrb[6].mxu1 %v612_v1 }
 0x372   :  { %v1673_v10 = vpop.f32.mrb[4].mxu1 }
 0x373   :  { %v1002_v2 = vmul.f32 %v1673_v10, %v1673_v10  ;;  %v899_v37 = vpop.f32.mrb[5].mxu1 }
 0x374   :  { %v922_v5 = vadd.f32 %v1673_v10, %v899_v37  ;;  %v1001_v6 = vmul.f32 %v899_v37, %v899_v37 }
 0x376   :  { %v1005_v8 = vadd.f32 %v1002_v2, %v1001_v6  ;;  %v1676_v9 = vpop.f32.mrb[6].mxu1 }
 0x377   :  { %v909_v13 = vpop.f32.mrb[7].mxu1  ;;  %v1004_v58 = vmul.f32 %v1676_v9, %v1676_v9 }
 0x378   :  { %v923_v14 = vadd.f32 %v922_v5, %v909_v13  ;;  %v1003_v17 = vmul.f32 %v909_v13, %v909_v13 }
 0x37a   :  { %v924_v60 = vadd.f32 %v1676_v9, %v923_v14  ;;  %v1006_v18 = vadd.f32 %v1005_v8, %v1003_v17 }
 0x37c   :  { %v925_v59 = vrot.slane %v924_v60, 4  ;;  %v1007_v62 = vadd.f32 %v1006_v18, %v1004_v58 }
 0x37e   :  { %v926_v24 = vadd.f32 %v925_v59, %v924_v60  ;;  %v1008_v27 = vrot.slane %v1007_v62, 4 }
 0x380   :  { %v927_v23 = vrot.slane %v926_v24, 2  ;;  %v1009_v32 = vadd.f32 %v1008_v27, %v1007_v62 }
 0x382   :  { %v928_v21 = vadd.f32 %v927_v23, %v926_v24 }
 0x384   :  { %v929_v63 = vrot.slane %v928_v21, 1 }
 0x386   :  { %v930_v48 = vadd.f32 %v929_v63, %v928_v21 }
 0x388   :  { %1710 = vmatmul.mubr.f32.vlgmr.msra.gmra.mrb[4].mxu0 %v930_v48 }
 0x389   :  { %2013 = vmatpush3.bf16.msra.mxu0 %v2165_v26  ;;  %1744 = vmatprep.mubr.msk.f32.mxu0 %vm2060_vm2, %v2061_v20  ;;  %v1010_v26 = vrot.slane %v1009_v32, 2 }
 0x38a   :  { %2014 = vmatprep.subr.bf16.mxu0 %v2059_v3 }
 0x38d   :  { %2016 = vmatpush3.bf16.msra.mxu0 %v2177_v31  ;;  %v1011_v31 = vadd.f32 %v1010_v26, %v1009_v32 }
 0x38e   :  { %2017 = vmatprep.subr.bf16.mxu0 %v2059_v3 }
 0x391   :  { %2019 = vmatpush3.bf16.msra.mxu0 %v2200_v39  ;;  %v1012_v39 = vrot.slane %v1011_v31, 1 }
 0x392   :  { %2020 = vmatprep.subr.bf16.mxu0 %v2059_v3 }
 0x395   :  { %2022 = vmatpush3.bf16.msra.mxu0 %v2403_v4  ;;  %v1013_v4 = vadd.f32 %v1012_v39, %v1011_v31 }
 0x396   :  { %2023 = vmatprep.subr.bf16.mxu0 %v2059_v3 }
 0x399   :  { %2025 = vmatpush3.bf16.msra.mxu0 %v2415_v7 }
 0x39a   :  { %2026 = vmatprep.subr.bf16.mxu0 %v2059_v3 }
 0x39d   :  { %2028 = vmatpush3.bf16.msra.mxu0 %v2427_v11 }
 0x39e   :  { %2029 = vmatprep.subr.bf16.mxu0 %v2059_v3 }
 0x3a1   :  { %2031 = vmatpush3.bf16.msra.mxu0 %v2439_v15 }
 0x3a2   :  { %2032 = vmatprep.subr.bf16.mxu0 %v2059_v3 }
 0x3a5   :  { %2034 = vmatpush3.bf16.msra.mxu0 %v2450_v19 }
 0x3a8   :  { %1745 = vmatmul.mubr.f32.vlgmr.msra.gmra.mrb[6].mxu0 %v1013_v4 }
 0x45b   :  { %v997_v20 = vpop.f32.mrb[4].mxu0 }
 0x45c   :  { %v1711_v28 = vpop.f32.mrb[5].mxu0  ;;  %v1084_v7 = vmul.f32 0.001953125, %v997_v20 }
 0x45e   :  { %v1086_v29 = vmul.f32 %v1084_v7, %v1084_v7 }
 0x47b   :  { %v1080_v30 = vpop.f32.mrb[6].mxu0 }
 0x47c   :  { %v1085_v33 = vmul.f32 0.001953125, %v1080_v30  ;;  %v1746_v34 = vpop.f32.mrb[7].mxu0 }
 0x47e   :  { %v1087_v11 = vsub.f32 %v1085_v33, %v1086_v29 }
 0x480   :  { %v1088_v35 = vadd.f32 1e-05, %v1087_v11 }
 0x482   :  { %2056 = vrsqrt.f32 %v1088_v35 }
 0x48c   :  { %v2057_v36 = vpop.eup %2056 }
 0x48d   :  { %v1090_v15 = vmul.f32 %v2057_v36, %v2555_v55 }
 0x48f   :  { %v1091_v12 = vmul.f32 %v1090_v15, %v1084_v7  ;;  %v1096_v3 = vrot.slane %v1090_v15, %v2558_v56 }
 0x491   :  { %v1092_v19 = vsub.f32 %v2564_v61, %v1091_v12  ;;  %v1097_v16 = vmul.f32 %v1096_v3, %v899_v37  ;;  %v1098_v40 = vmul.f32 %v1673_v10, %v1096_v3  ;;  %v1099_v41 = vmul.f32 %v1096_v3, %v909_v13 }
 0x492   :  { %v1100_v22 = vmul.f32 %v1676_v9, %v1096_v3 }
 0x493   :  { %v1105_v25 = vrot.slane %v1092_v19, %v2558_v56 }
 0x495   :  { %v1107_v43 = vadd.f32 %v1105_v25, %v1097_v16  ;;  %v1108_v44 = vadd.f32 %v1105_v25, %v1098_v40  ;;  %v1109_v46 = vadd.f32 %v1105_v25, %v1099_v41  ;;  %v1110_v49 = vadd.f32 %v1105_v25, %v1100_v22 }
 0x497   :  { %v1111_v55 = vadd.f32 %v2058_v50, %v1107_v43  ;;  %v1112_v51 = vadd.f32 %v1108_v44, %v2216_v45  ;;  %v1113_v52 = vadd.f32 %v1109_v46, %v2222_v47  ;;  %v1114_v61 = vadd.f32 %v1110_v49, %v2197_v38 }
 0x499   :  { %v1115_v53 = vmax.f32 %v1111_v55, 0.0  ;;  %v1116_v42 = vmax.f32 %v1112_v51, 0.0  ;;  %v1117_v54 = vmax.f32 %v1113_v52, 0.0  ;;  %v1118_v57 = vmax.f32 %v1114_v61, 0.0 }
 0x49b   :  { %1119 = vst [vmem:[%s2743_s8] sm:$0xff] %v1115_v53  ;;  %1120 = vst [vmem:[%s2743_s8 + $0x8] sm:$0xff] %v1116_v42 }
 0x49c   :  { %1121 = vst [vmem:[%s2743_s8 + $0x10] sm:$0xff] %v1117_v54  ;;  %1122 = vst [vmem:[%s2743_s8 + $0x18] sm:$0xff] %v1118_v57 }

</bundles_post_ra>
